<compile_context>
chip_gen: v7x
topology: tpu7x:2x2x1
jax: 0.10.0
libtpu: 0.0.40
codegen_flags: <defaults>
</compile_context>

<pallas_src>
import functools
import numpy as np
import jax
import jax.numpy as jnp
from jax.experimental import pallas as pl
from jax.experimental.pallas import tpu as pltpu


EXPERT_NORM_EPS = 1e-5  # matches torch nn.LayerNorm default inside MxDNAConvNet


def _default_vmem_limit():
    cap = 128 * 1024 * 1024
    try:
        info = pltpu.get_tpu_info()
        cap = int(getattr(info, "vmem_capacity_bytes", cap))
    except Exception:
        pass
    # v5e/v6e (128 MiB) -> 64 MiB scoped; v7x (64 MiB) -> 32 MiB scoped.
    return min(96 * 1024 * 1024, max(32 * 1024 * 1024, cap // 2))


_VMEM_LIMIT = _default_vmem_limit()


# ----------------------------- small helpers --------------------------------

def _round_up(x, m):
    return (x + m - 1) // m * m


def _pick_tile(n, target=512):
    """Largest row tile (multiple of 8, capped at `target`) covering n rows."""
    return min(target, _round_up(max(n, 1), 8))


def _pick_moe_tile(n, kmax, hp):
    """MoE unit tile capped by a double-buffered activation VMEM budget."""
    budget = 16 * 1024 * 1024
    per_row = (kmax * hp + 2 * hp + 1) * 4 * 2       # in + out + scale, x2 buffers
    cap = max(8, (budget // per_row) // 8 * 8)
    return int(min(_pick_tile(n, target=512), cap))


def _cparams(*sem):
    return pltpu.CompilerParams(dimension_semantics=sem,
                                vmem_limit_bytes=_VMEM_LIMIT)


def find_closest_factor(N, M):
    closest_factor = None
    min_difference = float("inf")
    for d in range(1, int(N ** 0.5) + 1):
        if N % d == 0:
            for factor in (d, N // d):
                difference = abs(factor - M)
                if difference < min_difference:
                    min_difference = difference
                    closest_factor = factor
    return int(closest_factor)


# ------------------- kernel 1: fused LayerNorm + router gate -----------------

def _ln_gate_kernel(x_ref, sp_ref, g_ref, b_ref, gw_ref, hs_ref, lg_ref, *,
                    hvalid, eps):
    x = x_ref[...]                                   # (TM, Hp) f32, padded cols 0
    mu = jnp.sum(x, axis=-1, keepdims=True) / hvalid
    ex2 = jnp.sum(x * x, axis=-1, keepdims=True) / hvalid
    var = jnp.maximum(ex2 - mu * mu, 0.0)
    y = (x - mu) * jax.lax.rsqrt(var + eps) * g_ref[...] + b_ref[...]
    hs_ref[...] = y
    gate_in = (y * (1.0 - sp_ref[...])).astype(jnp.bfloat16)
    lg_ref[...] = jnp.dot(gate_in, gw_ref[...],
                          preferred_element_type=jnp.float32)


def ln_gate(x2d, special2d, gamma, beta, gate_w_pad, H, eps):
    N, Hp = x2d.shape
    EP = gate_w_pad.shape[1]
    TM = _pick_tile(N)
    Np = _round_up(N, TM)
    xp = jnp.pad(x2d, ((0, Np - N), (0, 0)))
    spp = jnp.pad(special2d, ((0, Np - N), (0, 0)))
    hs, lg = pl.pallas_call(
        functools.partial(_ln_gate_kernel, hvalid=float(H), eps=eps),
        out_shape=(jax.ShapeDtypeStruct((Np, Hp), jnp.float32),
                   jax.ShapeDtypeStruct((Np, EP), jnp.float32)),
        grid=(Np // TM,),
        in_specs=[
            pl.BlockSpec((TM, Hp), lambda i: (i, 0)),
            pl.BlockSpec((TM, 1), lambda i: (i, 0)),
            pl.BlockSpec((1, Hp), lambda i: (0, 0)),
            pl.BlockSpec((1, Hp), lambda i: (0, 0)),
            pl.BlockSpec((Hp, EP), lambda i: (0, 0)),
        ],
        out_specs=(pl.BlockSpec((TM, Hp), lambda i: (i, 0)),
                   pl.BlockSpec((TM, EP), lambda i: (i, 0))),
        compiler_params=_cparams("parallel"),
    )(xp, spp, gamma, beta, gate_w_pad)
    return hs[:N], lg[:N]


# ------------------- kernel 2: fused sparse Conv-MoE expert -------------------

def _moe_expert_kernel(te_ref, x_ref, sc_ref, wpre_ref, wgd_ref, ng_ref, nb_ref,
                       wpost_ref, o_ref, *, tu, kmax, hp, hvalid, eps):
    del te_ref                                       # consumed by the index maps
    x = x_ref[...]                                   # (TU*Kmax, Hp) f32
    # shared pointwise-pre: one (Hp, 2Hp) weight applied per tap (no block-diag)
    pre = jnp.dot(x.astype(jnp.bfloat16), wpre_ref[0],
                  preferred_element_type=jnp.float32)       # (TU*Kmax, 2Hp)
    g = pre[:, :hp] * jax.nn.sigmoid(pre[:, hp:])           # GLU per tap
    g2 = g.reshape(tu, kmax * hp)
    # grouped conv (kernel == stride) as one (TU, Kmax*Hp)@(Kmax*Hp, Hp) matmul
    acc = jnp.dot(g2.astype(jnp.bfloat16), wgd_ref[0],
                  preferred_element_type=jnp.float32)       # (TU, Hp)
    mu = jnp.sum(acc, axis=-1, keepdims=True) / hvalid
    ex2 = jnp.sum(acc * acc, axis=-1, keepdims=True) / hvalid
    var = jnp.maximum(ex2 - mu * mu, 0.0)
    yn = (acc - mu) * jax.lax.rsqrt(var + eps) * ng_ref[0] + nb_ref[0]
    ys = yn * jax.nn.sigmoid(yn)                            # SiLU
    out = jnp.dot(ys.astype(jnp.bfloat16), wpost_ref[0],
                  preferred_element_type=jnp.float32)
    o_ref[...] = sc_ref[...] * out                          # router scale fused


def moe_experts(unit_tokens, scale, tile_expert, wpre, wgd, norm_g, norm_b,
                wpost, TU, Kmax, Hp, H):
    """unit_tokens: (Utot*Kmax, Hp); scale: (Utot, 1); tile_expert: (Utot//TU,)."""
    UtotK = unit_tokens.shape[0]
    Utot = UtotK // Kmax
    num_tiles = Utot // TU
    grid_spec = pltpu.PrefetchScalarGridSpec(
        num_scalar_prefetch=1,
        grid=(num_tiles,),
        in_specs=[
            pl.BlockSpec((TU * Kmax, Hp), lambda i, te: (i, 0)),
            pl.BlockSpec((TU, 1), lambda i, te: (i, 0)),
            pl.BlockSpec((1, Hp, 2 * Hp), lambda i, te: (te[i], 0, 0)),
            pl.BlockSpec((1, Kmax * Hp, Hp), lambda i, te: (te[i], 0, 0)),
            pl.BlockSpec((1, 1, Hp), lambda i, te: (te[i], 0, 0)),
            pl.BlockSpec((1, 1, Hp), lambda i, te: (te[i], 0, 0)),
            pl.BlockSpec((1, Hp, Hp), lambda i, te: (te[i], 0, 0)),
        ],
        out_specs=pl.BlockSpec((TU, Hp), lambda i, te: (i, 0)),
    )
    return pl.pallas_call(
        functools.partial(_moe_expert_kernel, tu=TU, kmax=Kmax, hp=Hp,
                          hvalid=float(H), eps=EXPERT_NORM_EPS),
        out_shape=jax.ShapeDtypeStruct((Utot, Hp), jnp.float32),
        grid_spec=grid_spec,
        compiler_params=_cparams("arbitrary"),
    )(tile_expert, unit_tokens, scale, wpre, wgd, norm_g, norm_b, wpost)


# ------------- kernel 3: deformable block LN + offset/modulator conv ---------

def _deform_pre_kernel(x_ref, attn_ref, sp_ref, g_ref, b_ref, wom_ref, bom_ref,
                       xm_ref, om_ref, *, kh, hvalid, valid_len, eps):
    x = x_ref[0]                                             # (Mp, Hp) f32
    Mp = x.shape[0]
    omp = bom_ref.shape[1]
    mu = jnp.sum(x, axis=-1, keepdims=True) / hvalid
    ex2 = jnp.sum(x * x, axis=-1, keepdims=True) / hvalid
    var = jnp.maximum(ex2 - mu * mu, 0.0)
    y = (x - mu) * jax.lax.rsqrt(var + eps) * g_ref[...] + b_ref[...]
    pad = kh // 2
    row = jax.lax.broadcasted_iota(jnp.int32, (Mp, 1), 0)
    # Tap-accumulated offset/modulator conv (no im2col slab).  Conv zero-padding
    # only outside [0, valid_len); rows inside the padded sequence feed through
    # (== the reference, which runs the offset conv over the whole padded seq).
    om = jnp.zeros((Mp, omp), jnp.float32)
    for k in range(kh):
        shift = k - pad
        sh = (-shift) % Mp                      # out[t] = y[t + shift]
        rolled = y if sh == 0 else pltpu.roll(y, shift=sh, axis=0)
        src = row + shift
        ok = (src >= 0) & (src < valid_len)
        tap = jnp.where(ok, rolled, 0.0)
        om = om + jnp.dot(tap.astype(jnp.bfloat16), wom_ref[k],
                          preferred_element_type=jnp.float32)
    om_ref[0] = om + bom_ref[...]
    xm_ref[0] = y * (1.0 - sp_ref[0]) * attn_ref[0]


# ------------- kernel 4: fused bilinear blend + modulated conv + residual -----

def _deform_post_kernel(g0_ref, g1_ref, w0_ref, w1_ref, r_ref, wr_ref, o_ref, *,
                        kh, hp):
    acc = r_ref[...]                                         # residual, f32
    for k in range(kh):
        g0k = g0_ref[:, k * hp:(k + 1) * hp]
        g1k = g1_ref[:, k * hp:(k + 1) * hp]
        sk = g0k * w0_ref[:, k:k + 1] + g1k * w1_ref[:, k:k + 1]
        acc = acc + jnp.dot(sk.astype(jnp.bfloat16), wr_ref[k],
                            preferred_element_type=jnp.float32)
    o_ref[...] = acc


def deform_post(g0, g1, w0m, w1m, residual, wreg, kh, Hp):
    N = g0.shape[0]
    TM = _pick_tile(N)
    Np = _round_up(N, TM)
    padr = lambda a: jnp.pad(a, ((0, Np - N), (0, 0)))
    out = pl.pallas_call(
        functools.partial(_deform_post_kernel, kh=kh, hp=Hp),
        out_shape=jax.ShapeDtypeStruct((Np, Hp), jnp.float32),
        grid=(Np // TM,),
        in_specs=[
            pl.BlockSpec((TM, kh * Hp), lambda i: (i, 0)),
            pl.BlockSpec((TM, kh * Hp), lambda i: (i, 0)),
            pl.BlockSpec((TM, kh), lambda i: (i, 0)),
            pl.BlockSpec((TM, kh), lambda i: (i, 0)),
            pl.BlockSpec((TM, Hp), lambda i: (i, 0)),
            pl.BlockSpec((kh, Hp, Hp), lambda i: (0, 0, 0)),
        ],
        out_specs=pl.BlockSpec((TM, Hp), lambda i: (i, 0)),
        compiler_params=_cparams("parallel"),
    )(padr(g0), padr(g1), padr(w0m), padr(w1m), padr(residual), wreg)
    return out[:N]


# ----------------------------- host-side glue --------------------------------

def basic_unit_nms_fn(router_logits, kernel_sizes, attention_mask):
    # TODO(synk): basic_unit_nms_fn is not defined in the reference source; this
    # is a deterministic greedy non-overlapping NMS consistent with its
    # documented usage (only attention_mask is consulted; special positions keep
    # their exactly-zero logits) — verify against the real NMS semantics.
    B, L, _ = router_logits.shape
    center = -np.ones((B, L), np.int32)
    allm = -np.ones((B, L), np.int32)
    for b in range(B):
        scores = router_logits[b].max(-1)
        experts = router_logits[b].argmax(-1)
        occupied = attention_mask[b] == 0
        order = np.argsort(-scores, kind="stable")
        for t in order:
            if attention_mask[b, t] == 0:
                continue
            e = int(experts[t])
            k = int(kernel_sizes[e])
            start = t - (k - 1) // 2
            if start < 0 or start + k > L:
                continue
            if occupied[start:start + k].any():
                continue
            center[b, t] = e
            allm[b, start:start + k] = e
            occupied[start:start + k] = True
    return center, allm


# ----------------------------- parameter packing -----------------------------

def pack_params(params, config):
    """One-time host-side packing into lane-dense, expert-stacked bf16 weights."""
    H = config.hidden_size
    Hp = _round_up(H, 128)
    E = config.num_local_experts
    ks_list = list(config.expert_kernel_sizes)
    Kmax = max(ks_list)
    kh = config.deformable_conv_kernel_size
    EP = _round_up(E, 128)
    OMP = _round_up(2 * kh, 128)

    gate_w = np.asarray(params["gate_w"], np.float32)            # (E, H)
    gate_w_pad = np.zeros((Hp, EP), np.float32)
    gate_w_pad[:H, :E] = gate_w.T

    ln_in_g = np.zeros((1, Hp), np.float32); ln_in_g[0, :H] = np.asarray(params["ln_in_g"])
    ln_in_b = np.zeros((1, Hp), np.float32); ln_in_b[0, :H] = np.asarray(params["ln_in_b"])

    wpre = np.zeros((E, Hp, 2 * Hp), np.float32)
    wgd = np.zeros((E, Kmax * Hp, Hp), np.float32)
    norm_g = np.zeros((E, 1, Hp), np.float32)
    norm_b = np.zeros((E, 1, Hp), np.float32)
    wpost = np.zeros((E, Hp, Hp), np.float32)
    for e, exp in enumerate(params["experts"]):
        ks = exp["kernel_size"]
        G = exp["groups"]
        cg = H // G
        wp = np.asarray(exp["wpre"], np.float32)                 # (2H, H) Linear
        wpre[e, :H, :H] = wp[:H].T                               # 'a' half
        wpre[e, :H, Hp:Hp + H] = wp[H:].T                        # 'b' half
        wg = np.asarray(exp["wgrouped"], np.float32)             # (H, H//G, ks)
        for co in range(H):
            gidx = co // cg
            for j in range(cg):
                ci = gidx * cg + j
                wgd[e, np.arange(ks) * Hp + ci, co] = wg[co, j, :]
        norm_g[e, 0, :H] = np.asarray(exp["norm_g"], np.float32)
        norm_b[e, 0, :H] = np.asarray(exp["norm_b"], np.float32)
        wpost[e, :H, :H] = np.asarray(exp["wpost"], np.float32).T

    dp = params["deform"]
    d_ln_g = np.zeros((1, Hp), np.float32); d_ln_g[0, :H] = np.asarray(dp["ln_g"])
    d_ln_b = np.zeros((1, Hp), np.float32); d_ln_b[0, :H] = np.asarray(dp["ln_b"])
    off_w = np.asarray(dp["offset_w"], np.float32)               # (kh, H, kh)
    mod_w = np.asarray(dp["mod_w"], np.float32)
    d_wom = np.zeros((kh, Hp, OMP), np.float32)
    for k in range(kh):
        d_wom[k, :H, :kh] = off_w[:, :, k].T
        d_wom[k, :H, kh:2 * kh] = mod_w[:, :, k].T
    d_bom = np.zeros((1, OMP), np.float32)
    d_bom[0, :kh] = np.asarray(dp["offset_b"], np.float32)
    d_bom[0, kh:2 * kh] = np.asarray(dp["mod_b"], np.float32)
    wr = np.asarray(dp["regular_w"], np.float32)[:, :, :, 0]     # (Ho, Hi, kh)
    d_wreg = np.zeros((kh, Hp, Hp), np.float32)
    for k in range(kh):
        d_wreg[k, :H, :H] = wr[:, :, k].T

    return {
        "H": H, "Hp": Hp, "EP": EP, "OMP": OMP, "Kmax": Kmax,
        "ln_in_g": jnp.asarray(ln_in_g), "ln_in_b": jnp.asarray(ln_in_b),
        "gate_w_pad": jnp.asarray(gate_w_pad, jnp.bfloat16),
        "wpre": jnp.asarray(wpre, jnp.bfloat16),
        "wgd": jnp.asarray(wgd, jnp.bfloat16),
        "norm_g": jnp.asarray(norm_g), "norm_b": jnp.asarray(norm_b),
        "wpost": jnp.asarray(wpost, jnp.bfloat16),
        "d_ln_g": jnp.asarray(d_ln_g), "d_ln_b": jnp.asarray(d_ln_b),
        "d_wom": jnp.asarray(d_wom, jnp.bfloat16),
        "d_bom": jnp.asarray(d_bom),
        "d_wreg": jnp.asarray(d_wreg, jnp.bfloat16),
    }


# ----------------------------- blocks -----------------------------------------

def deform_conv_block(packed, config, hs_r, attn_r_f, sp_r_f, M):
    """1-D deformable conv: fused LN + offset/mod conv (Pallas), bilinear gather
    (XLA), fused blend + modulated regular conv + residual (Pallas)."""
    B, Mp, Hp = hs_r.shape
    kh = config.deformable_conv_kernel_size
    pad = kh // 2
    eps = config.layer_norm_eps
    H = packed["H"]
    OMP = packed["OMP"]

    # TODO(synk): for long sequences this should be row-tiled with a kh//2 halo
    # instead of grid=(B,) whole-sequence blocks (re-derive for v7x's 64 MiB VMEM).
    xm, om = pl.pallas_call(
        functools.partial(_deform_pre_kernel, kh=kh, hvalid=float(H),
                          valid_len=M, eps=eps),
        out_shape=(jax.ShapeDtypeStruct((B, Mp, Hp), jnp.float32),
                   jax.ShapeDtypeStruct((B, Mp, OMP), jnp.float32)),
        grid=(B,),
        in_specs=[
            pl.BlockSpec((1, Mp, Hp), lambda b: (b, 0, 0)),
            pl.BlockSpec((1, Mp, 1), lambda b: (b, 0, 0)),
            pl.BlockSpec((1, Mp, 1), lambda b: (b, 0, 0)),
            pl.BlockSpec((1, Hp), lambda b: (0, 0)),
            pl.BlockSpec((1, Hp), lambda b: (0, 0)),
            pl.BlockSpec((kh, Hp, OMP), lambda b: (0, 0, 0)),
            pl.BlockSpec((1, OMP), lambda b: (0, 0)),
        ],
        out_specs=(pl.BlockSpec((1, Mp, Hp), lambda b: (b, 0, 0)),
                   pl.BlockSpec((1, Mp, OMP), lambda b: (b, 0, 0))),
        compiler_params=_cparams("parallel"),
    )(hs_r, attn_r_f[..., None], sp_r_f[..., None],
      packed["d_ln_g"], packed["d_ln_b"], packed["d_wom"], packed["d_bom"])

    x_off = om[..., :kh]                                   # (B, Mp, kh)
    modulator = 2.0 * jax.nn.sigmoid(om[..., kh:2 * kh])

    # bilinear sampling along the sequence axis (data-dependent gather, XLA)
    # TODO(synk): could be moved into the kernel via scalar-prefetched integer
    # offsets; no clean static Pallas expression for the per-element gather.
    t_idx = jnp.arange(Mp, dtype=jnp.float32)[None, :, None]
    k_idx = jnp.arange(kh, dtype=jnp.float32)[None, None, :]
    pos = t_idx - pad + k_idx + x_off                      # (B, Mp, kh)
    p0 = jnp.floor(pos)
    frac = pos - p0

    def gather_rows(pidx):
        valid = (pidx >= 0) & (pidx <= Mp - 1)
        pc = jnp.clip(pidx, 0, Mp - 1).astype(jnp.int32)
        xb = jnp.broadcast_to(xm[:, :, None, :], (B, Mp, kh, Hp))
        pcb = jnp.broadcast_to(pc[..., None], (B, Mp, kh, Hp))
        g = jnp.take_along_axis(xb, pcb, axis=1)
        return jnp.where(valid[..., None], g, 0.0)

    g0 = gather_rows(p0).reshape(B * Mp, kh * Hp)
    g1 = gather_rows(p0 + 1.0).reshape(B * Mp, kh * Hp)
    w0m = ((1.0 - frac) * modulator).reshape(B * Mp, kh)
    w1m = (frac * modulator).reshape(B * Mp, kh)

    out_flat = deform_post(g0, g1, w0m, w1m, hs_r.reshape(B * Mp, Hp),
                           packed["d_wreg"], kh, Hp)
    return out_flat.reshape(B, Mp, Hp)


def mxdna_learnt_tokenization_forward(packed, config, hidden_states,
                                      attention_mask, special_tokens_mask):
    B, L, H = hidden_states.shape
    Hp = packed["Hp"]
    E = config.num_local_experts
    ks_list = list(config.expert_kernel_sizes)
    Kmax = packed["Kmax"]
    eps = config.layer_norm_eps

    hidden_states = hidden_states.astype(jnp.float32)
    residual_flat = jnp.pad(hidden_states.reshape(B * L, H),
                            ((0, 0), (0, Hp - H)))
    special_f = special_tokens_mask.astype(jnp.float32).reshape(B * L, 1)

    # ---- fused LayerNorm + masked router gate (single Pallas launch) ----
    hs_ln_flat, logits_pad = ln_gate(residual_flat, special_f,
                                     packed["ln_in_g"], packed["ln_in_b"],
                                     packed["gate_w_pad"], H, eps)
    router_logits = logits_pad[:, :E]
    router_weights = jax.nn.softmax(router_logits, axis=-1)     # on device

    # ---- host: NMS + index building (only small arrays cross the boundary) ---
    # TODO(synk): the greedy NMS is inherently data-dependent and stays on host;
    # the device_get below is the single remaining pipeline sync.
    rl_np = np.asarray(jax.device_get(router_logits), np.float32).reshape(B, L, E)
    am_np = np.asarray(jax.device_get(attention_mask), np.int32)
    sp_np = np.asarray(jax.device_get(special_tokens_mask), np.int32)
    center_np, all_np = basic_unit_nms_fn(rl_np, np.array(ks_list, np.int32), am_np)

    center_flat = center_np.reshape(-1)
    all_flat = all_np.reshape(-1)

    groups = []
    max_units = 0
    for e, ks in enumerate(ks_list):
        tok = np.nonzero(all_flat == e)[0].astype(np.int32)
        if tok.size == 0:
            groups.append(None)
            continue
        assert tok.size % ks == 0
        U = tok.size // ks
        cen = np.nonzero(center_flat == e)[0].astype(np.int32)
        assert cen.size == U
        groups.append((tok.reshape(U, ks), cen))
        max_units = max(max_units, U)

    # ---- sparse Conv-MoE: single scalar-prefetch Pallas kernel -----------
    final_flat = jnp.zeros((B * L, Hp), jnp.float32)
    if max_units > 0:
        TU = _pick_moe_tile(max_units, Kmax, Hp)
        gi_list, si_list, ue_list, uv_list, te_list = [], [], [], [], []
        for e, g in enumerate(groups):
            if g is None:
                continue
            tok2d, cen = g
            U, ks = tok2d.shape
            Upad = _round_up(U, TU)
            gi = np.zeros((Upad, Kmax), np.int32); gi[:U, :ks] = tok2d
            si = np.zeros((Upad,), np.int32); si[:U] = cen
            ue = np.full((Upad,), e, np.int32)
            uv = np.zeros((Upad,), np.float32); uv[:U] = 1.0
            gi_list.append(gi); si_list.append(si)
            ue_list.append(ue); uv_list.append(uv)
            te_list.extend([e] * (Upad // TU))
        gather_idx = np.concatenate(gi_list, 0)                   # (Utot, Kmax)
        scatter_idx = jnp.asarray(np.concatenate(si_list, 0))     # (Utot,)
        unit_expert = jnp.asarray(np.concatenate(ue_list, 0))
        unit_valid = jnp.asarray(np.concatenate(uv_list, 0))
        tile_expert = jnp.asarray(np.array(te_list, np.int32))    # (num_tiles,)

        # per-unit router scale (device softmax gathered by host-built indices);
        # folded into the MoE kernel epilogue.
        scale = (router_weights[scatter_idx, unit_expert] * unit_valid)[:, None]

        # TODO(synk): the unit-token gather could be DMA'd inside the kernel via
        # scalar-prefetched per-unit start offsets to avoid this HBM round trip.
        unit_tokens = jnp.take(hs_ln_flat, jnp.asarray(gather_idx.reshape(-1)),
                               axis=0)                            # (Utot*Kmax, Hp)
        expert_out = moe_experts(unit_tokens, scale, tile_expert,
                                 packed["wpre"], packed["wgd"],
                                 packed["norm_g"], packed["norm_b"],
                                 packed["wpost"], TU, Kmax, Hp, H)
        final_flat = final_flat.at[scatter_idx].add(expert_out)

    hidden_out_flat = residual_flat + final_flat

    # ---- new attention mask + reorder (gather indices built on host) ----
    basic_unit_mask_np = sp_np + (center_np != -1).astype(np.int32)
    new_attn_np = (basic_unit_mask_np * am_np) != 0
    counts = new_attn_np.sum(-1)
    M = max(int(counts.max()), 1)
    Mp = _round_up(M, 8)

    gpos = np.zeros((B, Mp), np.int32)
    gvalid = np.zeros((B, Mp), np.float32)
    attn_r_np = np.zeros((B, Mp), np.int32)
    sp_r_np = np.zeros((B, Mp), np.int32)
    for b in range(B):
        idx = np.nonzero(new_attn_np[b])[0]
        n = idx.size
        gpos[b, :n] = b * L + idx
        gvalid[b, :n] = 1.0
        attn_r_np[b, :n] = 1
        sp_r_np[b, :n] = sp_np[b, idx]

    hs_r = jnp.take(hidden_out_flat, jnp.asarray(gpos).reshape(-1),
                    axis=0).reshape(B, Mp, Hp)
    hs_r = hs_r * jnp.asarray(gvalid)[..., None]

    out_full = deform_conv_block(packed, config, hs_r,
                                 jnp.asarray(attn_r_np.astype(np.float32)),
                                 jnp.asarray(sp_r_np.astype(np.float32)), M)
    out = out_full[:, :M, :H]
    attn_r = jnp.asarray(attn_r_np[:, :M])
    sp_r = jnp.asarray(sp_r_np[:, :M])

    def reorder_back(sorted_x):
        sorted_x = np.asarray(sorted_x)
        orig = np.zeros((B, L) + sorted_x.shape[2:], dtype=sorted_x.dtype)
        for b in range(B):
            idx = np.nonzero(new_attn_np[b])[0]
            orig[b, idx] = sorted_x[b, :idx.size]
        return orig

    return out, attn_r, sp_r, reorder_back


# ----------------------------- config / params -------------------------------

class Config:
    hidden_size = 32
    num_local_experts = 3
    expert_kernel_sizes = [2, 3, 4]
    deformable_conv_kernel_size = 3
    layer_norm_eps = 1e-5
    initializer_range = 0.02
    router_jitter_noise = 0.0


def init_params(config, key):
    H = config.hidden_size
    E = config.num_local_experts
    std = config.initializer_range
    keys = jax.random.split(key, 16)

    def tn(k, shape):
        return std * jax.random.truncated_normal(k, -2.0, 2.0, shape, jnp.float32)

    params = {
        "basic_unit_masked_token_embedding": tn(keys[0], (H,)),  # unused in fwd
        "gate_w": tn(keys[1], (E, H)),
        "ln_in_g": jnp.ones((H,), jnp.float32),
        "ln_in_b": jnp.zeros((H,), jnp.float32),
    }
    experts = []
    for i, ks in enumerate(config.expert_kernel_sizes):
        G = find_closest_factor(H, ks)
        kk = jax.random.split(keys[2 + i], 3)
        experts.append(dict(
            kernel_size=ks, groups=G,
            wpre=tn(kk[0], (2 * H, H)),
            wgrouped=tn(kk[1], (H, H // G, ks)),
            norm_g=jnp.ones((H,), jnp.float32),
            norm_b=jnp.zeros((H,), jnp.float32),
            wpost=tn(kk[2], (H, H)),
        ))
    params["experts"] = experts
    kh = config.deformable_conv_kernel_size
    params["deform"] = dict(
        ln_g=jnp.ones((H,), jnp.float32), ln_b=jnp.zeros((H,), jnp.float32),
        offset_w=jnp.zeros((kh, H, kh), jnp.float32),   # __init__ sets these to 0
        offset_b=jnp.zeros((kh,), jnp.float32),
        mod_w=jnp.zeros((kh, H, kh), jnp.float32),
        mod_b=jnp.zeros((kh,), jnp.float32),
        regular_w=tn(keys[10], (H, H, kh, 1)),
    )
    return params


# ----------------------------- main -------------------------------------------

if __name__ == "__main__":
    config = Config()
    key = jax.random.PRNGKey(0)
    kp, kx = jax.random.split(key)
    params = init_params(config, kp)
    packed = pack_params(params, config)

    B, L, H = 2, 16, config.hidden_size
    hidden_states = jax.random.normal(kx, (B, L, H), jnp.float32)
    attention_mask = jnp.array([[1] * 16, [1] * 13 + [0] * 3], dtype=jnp.int32)
    special_tokens_mask = jnp.zeros((B, L), jnp.int32)
    special_tokens_mask = special_tokens_mask.at[:, 0].set(1)
    special_tokens_mask = special_tokens_mask.at[0, 15].set(1).at[1, 12].set(1)

    out, attn_out, sp_out, reorder_back = mxdna_learnt_tokenization_forward(
        packed, config, hidden_states, attention_mask, special_tokens_mask)
    jax.block_until_ready(out)
    _ = reorder_back(np.asarray(jax.device_get(out)))  # exercise reorder_back
    assert out.shape[0] == B and out.shape[2] == H
    assert np.all(np.isfinite(np.asarray(jax.device_get(out))))
    print("KERNEL_OK")
</pallas_src>

<mosaic_0001>
module attributes {stable_mosaic.version = 11 : i64} {
  func.func @_ln_gate_kernel(%arg0: i32, %arg1: memref<32x128xf32, #tpu.memory_space<vmem>>, %arg2: memref<32x1xf32, #tpu.memory_space<vmem>>, %arg3: memref<1x128xf32, #tpu.memory_space<vmem>>, %arg4: memref<1x128xf32, #tpu.memory_space<vmem>>, %arg5: memref<128x128xbf16, #tpu.memory_space<vmem>>, %arg6: memref<32x128xf32, #tpu.memory_space<vmem>>, %arg7: memref<32x128xf32, #tpu.memory_space<vmem>>) attributes {dimension_semantics = [#tpu.dimension_semantics<parallel>], iteration_bounds = array<i64: 1>, scalar_prefetch = 0 : i64, scratch_operands = 0 : i64, tpu.core_type = #tpu.core_type<tc>, window_params = [{transform_indices = @transform_0, window_bounds = array<i64: 32, 128>}, {transform_indices = @transform_1, window_bounds = array<i64: 32, 1>}, {pipeline_mode = #tpu.pipeline_mode<synchronous>, transform_indices = @transform_2, window_bounds = array<i64: 1, 128>}, {pipeline_mode = #tpu.pipeline_mode<synchronous>, transform_indices = @transform_3, window_bounds = array<i64: 1, 128>}, {pipeline_mode = #tpu.pipeline_mode<synchronous>, transform_indices = @transform_4, window_bounds = array<i64: 128, 128>}, {transform_indices = @transform_5, window_bounds = array<i64: 32, 128>}, {transform_indices = @transform_6, window_bounds = array<i64: 32, 128>}]} {
    %c0 = arith.constant 0 : index
    %c0_0 = arith.constant 0 : index
    %0 = vector.load %arg1[%c0, %c0_0] : memref<32x128xf32, #tpu.memory_space<vmem>>, vector<32x128xf32>
    %cst = arith.constant dense<0.000000e+00> : vector<32xf32>
    %1 = vector.multi_reduction <add>, %0, %cst [1] : vector<32x128xf32> to vector<32xf32>
    %2 = vector.shape_cast %1 : vector<32xf32> to vector<32x1xf32>
    %cst_1 = arith.constant 3.200000e+01 : f32
    %3 = vector.broadcast %cst_1 : f32 to vector<32x1xf32>
    %4 = arith.divf %2, %3 : vector<32x1xf32>
    %5 = arith.mulf %0, %0 : vector<32x128xf32>
    %cst_2 = arith.constant dense<0.000000e+00> : vector<32xf32>
    %6 = vector.multi_reduction <add>, %5, %cst_2 [1] : vector<32x128xf32> to vector<32xf32>
    %7 = vector.shape_cast %6 : vector<32xf32> to vector<32x1xf32>
    %cst_3 = arith.constant 3.200000e+01 : f32
    %8 = vector.broadcast %cst_3 : f32 to vector<32x1xf32>
    %9 = arith.divf %7, %8 : vector<32x1xf32>
    %10 = arith.mulf %4, %4 : vector<32x1xf32>
    %11 = arith.subf %9, %10 : vector<32x1xf32>
    %cst_4 = arith.constant 0.000000e+00 : f32
    %12 = vector.broadcast %cst_4 : f32 to vector<32x1xf32>
    %13 = arith.maximumf %11, %12 : vector<32x1xf32>
    %14 = vector.broadcast %4 : vector<32x1xf32> to vector<32x128xf32>
    %15 = arith.subf %0, %14 : vector<32x128xf32>
    %cst_5 = arith.constant 9.99999974E-6 : f32
    %16 = vector.broadcast %cst_5 : f32 to vector<32x1xf32>
    %17 = arith.addf %13, %16 : vector<32x1xf32>
    %18 = math.rsqrt %17 : vector<32x1xf32>
    %19 = vector.broadcast %18 : vector<32x1xf32> to vector<32x128xf32>
    %20 = arith.mulf %15, %19 : vector<32x128xf32>
    %c0_6 = arith.constant 0 : index
    %c0_7 = arith.constant 0 : index
    %21 = vector.load %arg3[%c0_6, %c0_7] : memref<1x128xf32, #tpu.memory_space<vmem>>, vector<1x128xf32>
    %22 = vector.broadcast %21 : vector<1x128xf32> to vector<32x128xf32>
    %23 = arith.mulf %20, %22 : vector<32x128xf32>
    %c0_8 = arith.constant 0 : index
    %c0_9 = arith.constant 0 : index
    %24 = vector.load %arg4[%c0_8, %c0_9] : memref<1x128xf32, #tpu.memory_space<vmem>>, vector<1x128xf32>
    %25 = vector.broadcast %24 : vector<1x128xf32> to vector<32x128xf32>
    %26 = arith.addf %23, %25 : vector<32x128xf32>
    %c0_10 = arith.constant 0 : index
    %c0_11 = arith.constant 0 : index
    %27 = vector.load %arg6[%c0_10, %c0_11] : memref<32x128xf32, #tpu.memory_space<vmem>>, vector<32x128xf32>
    tpu.vector_store %arg6[%c0_10, %c0_11], %26 {strides = array<i32>} : memref<32x128xf32, #tpu.memory_space<vmem>>, vector<32x128xf32>,
    %c0_12 = arith.constant 0 : index
    %c0_13 = arith.constant 0 : index
    %28 = vector.load %arg2[%c0_12, %c0_13] : memref<32x1xf32, #tpu.memory_space<vmem>>, vector<32x1xf32>
    %cst_14 = arith.constant 1.000000e+00 : f32
    %29 = vector.broadcast %cst_14 : f32 to vector<32x1xf32>
    %30 = arith.subf %29, %28 : vector<32x1xf32>
    %31 = vector.broadcast %30 : vector<32x1xf32> to vector<32x128xf32>
    %32 = arith.mulf %26, %31 : vector<32x128xf32>
    %33 = arith.truncf %32 : vector<32x128xf32> to vector<32x128xbf16>
    %c0_15 = arith.constant 0 : index
    %c0_16 = arith.constant 0 : index
    %34 = vector.load %arg5[%c0_15, %c0_16] : memref<128x128xbf16, #tpu.memory_space<vmem>>, vector<128x128xbf16>
    %cst_17 = arith.constant dense<0.000000e+00> : vector<32x128xf32>
    %35 = tpu.matmul %33, %34, %cst_17 {dimension_numbers = #tpu.dot_dimension_numbers<[1], [0], [0], [1], [0, 0, 1, 1], [], []>} : vector<32x128xbf16>, vector<128x128xbf16>, vector<32x128xf32> -> vector<32x128xf32>
    %c0_18 = arith.constant 0 : index
    %c0_19 = arith.constant 0 : index
    %36 = vector.load %arg7[%c0_18, %c0_19] : memref<32x128xf32, #tpu.memory_space<vmem>>, vector<32x128xf32>
    tpu.vector_store %arg7[%c0_18, %c0_19], %35 {strides = array<i32>} : memref<32x128xf32, #tpu.memory_space<vmem>>, vector<32x128xf32>,
    return
  }
  func.func @transform_0(%arg0: i32) -> (i32, i32) {
    %c0_i32 = arith.constant 0 : i32
    %c0_i32_0 = arith.constant 0 : i32
    return %arg0, %c0_i32 : i32, i32
  }
  func.func @transform_1(%arg0: i32) -> (i32, i32) {
    %c0_i32 = arith.constant 0 : i32
    %c0_i32_0 = arith.constant 0 : i32
    return %arg0, %c0_i32 : i32, i32
  }
  func.func @transform_2(%arg0: i32) -> (i32, i32) {
    %c0_i32 = arith.constant 0 : i32
    %c0_i32_0 = arith.constant 0 : i32
    %c0_i32_1 = arith.constant 0 : i32
    return %c0_i32, %c0_i32_0 : i32, i32
  }
  func.func @transform_3(%arg0: i32) -> (i32, i32) {
    %c0_i32 = arith.constant 0 : i32
    %c0_i32_0 = arith.constant 0 : i32
    %c0_i32_1 = arith.constant 0 : i32
    return %c0_i32, %c0_i32_0 : i32, i32
  }
  func.func @transform_4(%arg0: i32) -> (i32, i32) {
    %c0_i32 = arith.constant 0 : i32
    %c0_i32_0 = arith.constant 0 : i32
    %c0_i32_1 = arith.constant 0 : i32
    return %c0_i32, %c0_i32_0 : i32, i32
  }
  func.func @transform_5(%arg0: i32) -> (i32, i32) {
    %c0_i32 = arith.constant 0 : i32
    %c0_i32_0 = arith.constant 0 : i32
    return %arg0, %c0_i32 : i32, i32
  }
  func.func @transform_6(%arg0: i32) -> (i32, i32) {
    %c0_i32 = arith.constant 0 : i32
    %c0_i32_0 = arith.constant 0 : i32
    return %arg0, %c0_i32 : i32, i32
  }
}

</mosaic_0001>

<bundles_post_ra>
// kernel: tpu_custom_call.1
= control target key start
LH: loop header
LB: loop body
LE: loop exit
PB: predicated region body
PF: predicated region fallthrough
CT: control target
= control target key end

     0   :  { %12 = vsyncpa [#allocation3], 0  ;;  %s771_s0 = inlined_call_operand.hbm [shape: f32[32,128], index: 0, kind: input, shape index: {}]   ;;  %s772_s1 = inlined_call_operand.hbm [shape: f32[32,1], index: 1, kind: input, shape index: {}]   ;;  %s773_s2 = inlined_call_operand.hbm [shape: f32[1,128], index: 2, kind: input, shape index: {}]   ;;  %s774_s3 = inlined_call_operand.hbm [shape: f32[1,128], index: 3, kind: input, shape index: {}]   ;;  %s775_s4 = inlined_call_operand.hbm [shape: bf16[128,128], index: 4, kind: input, shape index: {}]   ;;  %s776_s5 = inlined_call_operand.hbm [shape: f32[32,128], index: 5, kind: output, shape index: {0}]   ;;  %s777_s6 = inlined_call_operand.hbm [shape: f32[32,128], index: 6, kind: output, shape index: {1}]  }
   0x1   :  { %13 = vsyncpa [#allocation6], 0 }
   0x2   :  { %14 = vsyncpa [#allocation9], 0 }
   0x3   :  { %15 = vsyncpa [#allocation4], 0 }
   0x4   :  { %16 = vsyncpa [#allocation13], 0  ;;  %s596_s21 = smov [#allocation5]   ;;  %s597_s23 = smov [#allocation8]  }
   0x5   :  { %s34_s22 = sshll.u32 %s596_s21, 4  ;;  %s57_s24 = sshll.u32 %s597_s23, 4  ;;  %s35_s22 = int_to_ptr.vmem [resolvable:$true] %s34_s22  ;;  %s643_s24 = int_to_ptr.vmem [resolvable:$true] %s57_s24 }
   0x6   :  { %s432_s27 = scalar_lea.hbm %s772_s1, 512 }
   0x7   :  { %p433_p0 = scmp.ne.s32.totalorder %s772_s1, %s432_s27  ;;  %p436_p1 = scmp.lt.u32.totalorder %s432_s27, %s772_s1 }
   0x9   :  { %p438_p2 = pnand %p436_p1, %p433_p0 }
   0xb   :  { %441 = shalt.err (!%p438_p2)
}
   0xc   :  { %s442_s8 = scalar_lea.vmem %s35_s22, 512  ;;  %p447_p4 = scmp.lt.s32.totalorder %s35_s22, %s35_s22 }
   0xd   :  { %p443_p3 = scmp.ne.s32.totalorder %s35_s22, %s442_s8  ;;  %p448_p5 = scmp.lt.s32.totalorder %s442_s8, %s442_s8 }
   0xf   :  { %p449_p6 = por %p448_p5, %p447_p4 }
  0x11   :  { %p450_p7 = pnand %p449_p6, %p443_p3 }
  0x13   :  { %453 = shalt.err (!%p450_p7)
}
  0x14   :  { %s598_s9 = smov 128   ;;  %s599_s10 = smov 8  }
  0x15   :  { %40 = dma.hbm_to_vmem [thread:$0]  %s772_s1, 512, %s35_s22, [#allocation6], %s598_s9, %s598_s9, %s599_s10  }
  0x16   :  { %s454_s15 = scalar_lea.hbm %s774_s3, 16 }
  0x17   :  { %p455_p8 = scmp.ne.s32.totalorder %s774_s3, %s454_s15  ;;  %p458_p9 = scmp.lt.u32.totalorder %s454_s15, %s774_s3 }
  0x19   :  { %p460_p10 = pnand %p458_p9, %p455_p8 }
  0x1b   :  { %463 = shalt.err (!%p460_p10)
}
  0x1c   :  { %s464_s20 = scalar_lea.vmem %s643_s24, 16  ;;  %s468_s1 = scalar_lea.vmem %s643_s24, 32 }
  0x1d   :  { %p465_p11 = scmp.ne.s32.totalorder %s643_s24, %s464_s20  ;;  %p469_p12 = scmp.lt.s32.totalorder %s643_s24, %s643_s24 }
  0x1e   :  { %p470_p13 = scmp.lt.s32.totalorder %s468_s1, %s464_s20 }
  0x20   :  { %p471_p0 = por %p470_p13, %p469_p12 }
  0x22   :  { %p472_p1 = pnand %p471_p0, %p465_p11 }
  0x24   :  { %475 = shalt.err (!%p472_p1)
}
  0x25   :  { %60 = dma.hbm_to_vmem [thread:$0]  %s774_s3, 16, %s643_s24, [#allocation9]  }
  0x26   :  { %s600_s23 = smov [#allocation2]   ;;  %s601_s26 = smov [#allocation7]  }
  0x27   :  { %s22_s25 = sshll.u32 %s600_s23, 4  ;;  %s47_s27 = sshll.u32 %s601_s26, 4  ;;  %s23_s25 = int_to_ptr.vmem [resolvable:$true] %s22_s25  ;;  %s48_s27 = int_to_ptr.vmem [resolvable:$true] %s47_s27 }
  0x28   :  { %s476_s30 = scalar_lea.hbm %s771_s0, 512 }
  0x29   :  { %p477_p2 = scmp.ne.s32.totalorder %s771_s0, %s476_s30  ;;  %p480_p3 = scmp.lt.u32.totalorder %s476_s30, %s771_s0 }
  0x2b   :  { %p482_p4 = pnand %p480_p3, %p477_p2 }
  0x2d   :  { %485 = shalt.err (!%p482_p4)
}
  0x2e   :  { %s486_s3 = scalar_lea.vmem %s23_s25, 512  ;;  %p491_p6 = scmp.lt.s32.totalorder %s23_s25, %s23_s25 }
  0x2f   :  { %p487_p5 = scmp.ne.s32.totalorder %s23_s25, %s486_s3  ;;  %p492_p7 = scmp.lt.s32.totalorder %s486_s3, %s486_s3 }
  0x31   :  { %p493_p8 = por %p492_p7, %p491_p6 }
  0x33   :  { %p494_p9 = pnand %p493_p8, %p487_p5 }
  0x35   :  { %497 = shalt.err (!%p494_p9)
}
  0x36   :  { %28 = dma.hbm_to_vmem [thread:$0]  %s771_s0, 512, %s23_s25, [#allocation3], %s598_s9, %s598_s9, %s599_s10  }
  0x37   :  { %s498_s16 = scalar_lea.hbm %s773_s2, 16 }
  0x38   :  { %p499_p10 = scmp.ne.s32.totalorder %s773_s2, %s498_s16  ;;  %p502_p11 = scmp.lt.u32.totalorder %s498_s16, %s773_s2 }
  0x3a   :  { %p504_p12 = pnand %p502_p11, %p499_p10 }
  0x3c   :  { %507 = shalt.err (!%p504_p12)
}
  0x3d   :  { %s508_s1 = scalar_lea.vmem %s48_s27, 16  ;;  %s512_s21 = scalar_lea.vmem %s48_s27, 32 }
  0x3e   :  { %p509_p13 = scmp.ne.s32.totalorder %s48_s27, %s508_s1  ;;  %p513_p0 = scmp.lt.s32.totalorder %s48_s27, %s48_s27 }
  0x3f   :  { %p514_p1 = scmp.lt.s32.totalorder %s512_s21, %s508_s1 }
  0x41   :  { %p515_p2 = por %p514_p1, %p513_p0 }
  0x43   :  { %p516_p3 = pnand %p515_p2, %p509_p13 }
  0x45   :  { %519 = shalt.err (!%p516_p3)
}
  0x46   :  { %50 = dma.hbm_to_vmem [thread:$0]  %s773_s2, 16, %s48_s27, [#allocation6]  }
  0x47   :  { %s602_s23 = smov [#allocation10]   ;;  %s520_s29 = scalar_lea.hbm %s775_s4, 1024 }
  0x48   :  { %s66_s25 = sshll.u32 %s602_s23, 4  ;;  %p521_p4 = scmp.ne.s32.totalorder %s775_s4, %s520_s29  ;;  %s67_s25 = int_to_ptr.vmem [resolvable:$true] %s66_s25 }
  0x49   :  { %p524_p5 = scmp.lt.u32.totalorder %s520_s29, %s775_s4 }
  0x4b   :  { %p526_p6 = pnand %p524_p5, %p521_p4 }
  0x4d   :  { %529 = shalt.err (!%p526_p6)
}
  0x4e   :  { %s530_s12 = scalar_lea.vmem %s67_s25, 1024  ;;  %p535_p8 = scmp.lt.s32.totalorder %s67_s25, %s67_s25 }
  0x4f   :  { %p531_p7 = scmp.ne.s32.totalorder %s67_s25, %s530_s12  ;;  %p536_p9 = scmp.lt.s32.totalorder %s530_s12, %s530_s12 }
  0x51   :  { %p537_p10 = por %p536_p9, %p535_p8 }
  0x53   :  { %p538_p11 = pnand %p537_p10, %p531_p7 }
  0x55   :  { %541 = shalt.err (!%p538_p11)
}
  0x56   :  { %s603_s2 = smov 64   ;;  %s604_s27 = smov 4  }
  0x57   :  { %72 = dma.hbm_to_vmem [thread:$0]  %s775_s4, 1024, %s67_s25, [#allocation9], %s603_s2, %s603_s2, %s604_s27  }
  0x58   :  { %586 = dma.done.wait [#allocation3], 512  }
  0x59   :  { %587 = vsyncadd [#allocation3], 4294966784 }
  0x5a   :  { %588 = dma.done.wait [#allocation6], 528  }
  0x5b   :  { %589 = vsyncadd [#allocation6], 4294966768 }
  0x5c   :  { %590 = dma.done.wait [#allocation9], 1040  }
  0x5d   :  { %591 = vsyncadd [#allocation9], 4294966256  ;;  %v605_v0 = vmov 0   ;;  %v717_v1 = vld [vmem:[#allocation2 + $0x10] sm:$0xff]  ;;  %v719_v2 = vld [vmem:[#allocation2] sm:$0xff]  ;;  %s606_s4 = smov [#allocation11]  }
  0x5e   :  { %415 = vset.pattern.permute.xlu1 %v605_v0  ;;  %414 = vset.pattern.permute.xlu0 %v605_v0  ;;  %v723_v3 = vld [vmem:[#allocation2 + $0x18] sm:$0xff]  ;;  %v725_v4 = vld [vmem:[#allocation2 + $0x8] sm:$0xff]  ;;  %v106_v6 = vmul.f32 %v719_v2, %v719_v2  ;;  %v108_v8 = vmul.f32 %v717_v1, %v717_v1  ;;  %v178_v12 = vld [vmem:[#allocation5 + $0x10] sm:$0xff]  ;;  %s332_s13 = sshll.u32 %s606_s4, 4  ;;  %s333_s13 = int_to_ptr.vmem [resolvable:$true] %s332_s13 }
  0x5f   :  { %97 = vadd.xlane.f32.xlu1 %v717_v1  ;;  %93 = vadd.xlane.f32.xlu0 %v719_v2  ;;  %v107_v5 = vmul.f32 %v725_v4, %v725_v4  ;;  %v109_v7 = vmul.f32 %v723_v3, %v723_v3  ;;  %v177_v9 = vld [vmem:[#allocation5 + $0x8] sm:$0xff]  ;;  %v176_v14 = vld [vmem:[#allocation5] sm:$0xff]  ;;  %v182_v15 = vsub.f32 1.0, %v178_v12  ;;  %v179_v16 = vld [vmem:[#allocation5 + $0x18] sm:$0xff]  ;;  %s542_s14 = scalar_lea.vmem %s333_s13, 512  ;;  %p547_p13 = scmp.lt.s32.totalorder %s333_s13, %s333_s13 }
  0x60   :  { %v416_v10 = vld [vmem:[#allocation10] sm:$0xff]   ;;  %v181_v11 = vsub.f32 1.0, %v177_v9  ;;  %v417_v13 = vld [vmem:[#allocation10 + $0x8] sm:$0xff]   ;;  %v180_v17 = vsub.f32 1.0, %v176_v14  ;;  %v418_v18 = vld [vmem:[#allocation10 + $0x10] sm:$0xff]   ;;  %v183_v19 = vsub.f32 1.0, %v179_v16  ;;  %p543_p12 = scmp.ne.s32.totalorder %s333_s13, %s542_s14  ;;  %p548_p0 = scmp.lt.s32.totalorder %s542_s14, %s542_s14 }
  0x61   :  { %382 = vmatprep.subr.bf16.mxu0 %v416_v10  ;;  %v419_v20 = vld [vmem:[#allocation10 + $0x18] sm:$0xff]   ;;  %v420_v21 = vld [vmem:[#allocation10 + $0x20] sm:$0xff]   ;;  %v421_v22 = vld [vmem:[#allocation10 + $0x28] sm:$0xff]  }
  0x62   :  { %383 = vmatpush3.bf16.msra.mxu0 %v416_v10  ;;  %v422_v23 = vld [vmem:[#allocation10 + $0x30] sm:$0xff]   ;;  %v423_v24 = vld [vmem:[#allocation10 + $0x38] sm:$0xff]   ;;  %p549_p1 = por %p548_p0, %p547_p13 }
  0x63   :  { %99 = vadd.xlane.f32.xlu1 %v723_v3  ;;  %95 = vadd.xlane.f32.xlu0 %v725_v4  ;;  %v362_v61 = vld [vmem:[#allocation7] ss:$0 sm:$0xff]  ;;  %v363_v0 = vld [vmem:[#allocation8] ss:$0 sm:$0xff] }
  0x64   :  { %384 = vmatprep.subr.bf16.mxu0 %v417_v13  ;;  %p550_p2 = pnand %p549_p1, %p543_p12 }
  0x66   :  { %385 = vmatpush3.bf16.msra.mxu0 %v417_v13 }
  0x67   :  { %112 = vadd.xlane.f32.xlu1 %v107_v5  ;;  %110 = vadd.xlane.f32.xlu0 %v106_v6 }
  0x68   :  { %386 = vmatprep.subr.bf16.mxu0 %v418_v18 }
  0x6a   :  { %387 = vmatpush3.bf16.msra.mxu0 %v418_v18 }
  0x6b   :  { %116 = vadd.xlane.f32.xlu1 %v109_v7  ;;  %114 = vadd.xlane.f32.xlu0 %v108_v8 }
  0x6c   :  { %388 = vmatprep.subr.bf16.mxu0 %v419_v20 }
  0x6e   :  { %389 = vmatpush3.bf16.msra.mxu0 %v419_v20 }
  0x6f   :  { %390 = vmatprep.subr.bf16.mxu0 %v420_v21 }
  0x72   :  { %391 = vmatpush3.bf16.msra.mxu0 %v420_v21 }
  0x73   :  { %392 = vmatprep.subr.bf16.mxu0 %v421_v22 }
  0x76   :  { %393 = vmatpush3.bf16.msra.mxu0 %v421_v22 }
  0x77   :  { %394 = vmatprep.subr.bf16.mxu0 %v422_v23 }
  0x7a   :  { %395 = vmatpush3.bf16.msra.mxu0 %v422_v23 }
  0x7b   :  { %396 = vmatprep.subr.bf16.mxu0 %v423_v24 }
  0x7c   :  { %191 = vperm.xlu1 %415, %v181_v11  }
  0x7e   :  { %397 = vmatpush3.bf16.msra.mxu0 %v423_v24 }
  0x80   :  { %196 = vperm.xlu1 %415, %v182_v15  }
  0x81   :  { %186 = vperm.xlu0 %414, %v180_v17  }
  0x84   :  { %201 = vperm.xlu1 %415, %v183_v19  }
  0xec   :  { %v98_v25 = vpop.xlane.xlu1 %97  ;;  %v94_v26 = vpop.xlane.xlu0 %93 }
  0xed   :  { %v102_v29 = vmul.f32 0.03125, %v94_v26  ;;  %v104_v31 = vmul.f32 0.03125, %v98_v25 }
  0xef   :  { %v122_v35 = vmul.f32 %v102_v29, %v102_v29  ;;  %v124_v41 = vmul.f32 %v104_v31, %v104_v31  ;;  %v134_v60 = vsub.f32 %v719_v2, %v102_v29  ;;  %v136_v9 = vsub.f32 %v717_v1, %v104_v31 }
  0xf0   :  { %v100_v27 = vpop.xlane.xlu1 %99  ;;  %v96_v28 = vpop.xlane.xlu0 %95 }
  0xf1   :  { %v103_v30 = vmul.f32 0.03125, %v96_v28  ;;  %v105_v32 = vmul.f32 0.03125, %v100_v27 }
  0xf3   :  { %v123_v36 = vmul.f32 %v103_v30, %v103_v30  ;;  %v125_v42 = vmul.f32 %v105_v32, %v105_v32  ;;  %v135_v58 = vsub.f32 %v725_v4, %v103_v30  ;;  %v137_v6 = vsub.f32 %v723_v3, %v105_v32 }
  0xf4   :  { %v113_v33 = vpop.xlane.xlu1 %112  ;;  %v111_v34 = vpop.xlane.xlu0 %110 }
  0xf5   :  { %v119_v37 = vmul.f32 0.03125, %v113_v33  ;;  %v118_v38 = vmul.f32 0.03125, %v111_v34 }
  0xf7   :  { %v127_v39 = vsub.f32 %v119_v37, %v123_v36  ;;  %v126_v40 = vsub.f32 %v118_v38, %v122_v35 }
  0xf8   :  { %v117_v43 = vpop.xlane.xlu1 %116  ;;  %v115_v44 = vpop.xlane.xlu0 %114 }
  0xf9   :  { %v131_v45 = vmax.f32 %v127_v39, 0.0  ;;  %v130_v46 = vmax.f32 %v126_v40, 0.0  ;;  %v121_v47 = vmul.f32 0.03125, %v117_v43  ;;  %v120_v48 = vmul.f32 0.03125, %v115_v44 }
  0xfb   :  { %v139_v49 = vadd.f32 1e-05, %v131_v45  ;;  %v138_v50 = vadd.f32 1e-05, %v130_v46  ;;  %v129_v51 = vsub.f32 %v121_v47, %v125_v42  ;;  %v128_v52 = vsub.f32 %v120_v48, %v124_v41 }
  0xfc   :  { %v192_v57 = vpop.permute.xlu1 %191 }
  0xfd   :  { %424 = vrsqrt.f32 %v139_v49  ;;  %v133_v53 = vmax.f32 %v129_v51, 0.0  ;;  %v132_v54 = vmax.f32 %v128_v52, 0.0 }
  0xfe   :  { %426 = vrsqrt.f32 %v138_v50 }
  0xff   :  { %v141_v55 = vadd.f32 1e-05, %v133_v53  ;;  %v140_v56 = vadd.f32 1e-05, %v132_v54 }
 0x100   :  { %v197_v10 = vpop.permute.xlu1 %196  ;;  %v187_v4 = vpop.permute.xlu0 %186 }
 0x101   :  { %428 = vrsqrt.f32 %v141_v55 }
 0x102   :  { %430 = vrsqrt.f32 %v140_v56 }
 0x104   :  { %v202_v21 = vpop.permute.xlu1 %201 }
 0x107   :  { %v425_v59 = vpop.eup %424 }
 0x108   :  { %v427_v62 = vpop.eup %426  ;;  %v147_v63 = vmul.f32 %v425_v59, %v135_v58 }
 0x109   :  { %v146_v5 = vmul.f32 %v427_v62, %v134_v60 }
 0x10a   :  { %v158_v7 = vmul.f32 %v362_v61, %v147_v63 }
 0x10b   :  { %v429_v8 = vpop.eup %428  ;;  %v157_v11 = vmul.f32 %v362_v61, %v146_v5 }
 0x10c   :  { %v431_v12 = vpop.eup %430  ;;  %v169_v13 = vadd.f32 %v363_v0, %v158_v7  ;;  %v149_v14 = vmul.f32 %v429_v8, %v137_v6 }
 0x10d   :  { %v148_v15 = vmul.f32 %v431_v12, %v136_v9  ;;  %v168_v16 = vadd.f32 %v363_v0, %v157_v11 }
 0x10e   :  { %173 = vst [vmem:[#allocation11 + $0x8] sm:$0xff] %v169_v13  ;;  %v205_v2 = vmul.f32 %v192_v57, %v169_v13  ;;  %v160_v17 = vmul.f32 %v362_v61, %v149_v14 }
 0x10f   :  { %v159_v18 = vmul.f32 %v362_v61, %v148_v15  ;;  %172 = vst [vmem:[#allocation11] sm:$0xff] %v168_v16  ;;  %v204_v19 = vmul.f32 %v187_v4, %v168_v16 }
 0x110   :  { %v171_v20 = vadd.f32 %v363_v0, %v160_v17 }
 0x111   :  { %v170_v3 = vadd.f32 %v363_v0, %v159_v18  ;;  %v208_v22 = vpack.c.bf16 %v205_v2, %v204_v19 }
 0x112   :  { %175 = vst [vmem:[#allocation11 + $0x18] sm:$0xff] %v171_v20  ;;  %v207_v1 = vmul.f32 %v202_v21, %v171_v20 }
 0x113   :  { %174 = vst [vmem:[#allocation11 + $0x10] sm:$0xff] %v170_v3  ;;  %v206_v23 = vmul.f32 %v197_v10, %v170_v3  ;;  %398 = vmatprep.mubr.bf16.mxu0 %v208_v22 }
 0x115   :  { %v209_v24 = vpack.c.bf16 %v207_v1, %v206_v23 }
 0x117   :  { %399 = vmatmul.mubr.bf16.vlgmr.msra.gmra.mrb[0].mxu0 %v209_v24 }
 0x118   :  { %553 = shalt.err (!%p550_p2)
}
 0x119   :  { %s554_s17 = scalar_lea.hbm %s776_s5, 512 }
 0x11a   :  { %p555_p3 = scmp.ne.s32.totalorder %s776_s5, %s554_s17  ;;  %p558_p4 = scmp.lt.u32.totalorder %s554_s17, %s776_s5 }
 0x11c   :  { %p560_p5 = pnand %p558_p4, %p555_p3 }
 0x11e   :  { %563 = shalt.err (!%p560_p5)
}
 0x11f   :  { %338 = dma.vmem_to_hbm [thread:$0]  %s333_s13, 512, %s776_s5, [#allocation4], %s598_s9, %s598_s9, %s599_s10  }
 0x120   :  { %s607_s22 = smov [#allocation12]  }
 0x121   :  { %s344_s23 = sshll.u32 %s607_s22, 4  ;;  %s345_s23 = int_to_ptr.vmem [resolvable:$true] %s344_s23 }
 0x122   :  { %s564_s25 = scalar_lea.vmem %s345_s23, 512  ;;  %p569_p7 = scmp.lt.s32.totalorder %s345_s23, %s345_s23 }
 0x123   :  { %p565_p6 = scmp.ne.s32.totalorder %s345_s23, %s564_s25  ;;  %p570_p8 = scmp.lt.s32.totalorder %s564_s25, %s564_s25 }
 0x125   :  { %p571_p9 = por %p570_p8, %p569_p7 }
 0x127   :  { %p572_p10 = pnand %p571_p9, %p565_p6 }
 0x1ea   :  { %v400_v25 = vpop.f32.mrb[0].mxu0 }
 0x1eb   :  { %325 = vst [vmem:[#allocation12 + $0x10] sm:$0xff] %v400_v25  ;;  %v308_v26 = vpop.f32.mrb[1].mxu0 }
 0x1ec   :  { %323 = vst [vmem:[#allocation12] sm:$0xff] %v308_v26  ;;  %v401_v27 = vpop.f32.mrb[2].mxu0 }
 0x1ed   :  { %326 = vst [vmem:[#allocation12 + $0x18] sm:$0xff] %v401_v27  ;;  %v311_v28 = vpop.f32.mrb[3].mxu0 }
 0x1ee   :  { %324 = vst [vmem:[#allocation12 + $0x8] sm:$0xff] %v311_v28 }
 0x1ef   :  { %575 = shalt.err (!%p572_p10)
}
 0x1f0   :  { %s576_s28 = scalar_lea.hbm %s777_s6, 512 }
 0x1f1   :  { %p577_p11 = scmp.ne.s32.totalorder %s777_s6, %s576_s28  ;;  %p580_p12 = scmp.lt.u32.totalorder %s576_s28, %s777_s6 }
 0x1f3   :  { %p582_p13 = pnand %p580_p12, %p577_p11 }
 0x1f5   :  { %585 = shalt.err (!%p582_p13)
}
 0x1f6   :  { %350 = dma.vmem_to_hbm [thread:$0]  %s345_s23, 512, %s777_s6, [#allocation13], %s598_s9, %s598_s9, %s599_s10  }
 0x1f7   :  { %592 = dma.done.wait [#allocation4], 512  }
 0x1f8   :  { %593 = vsyncadd [#allocation4], 4294966784 }
 0x1f9   :  { %594 = dma.done.wait [#allocation13], 512  }
 0x1fa   :  { %595 = vsyncadd [#allocation13], 4294966784 }
 0x1fb   :  { %357 = vsyncpa [#allocation3], 1 }
 0x1fc   :  { %358 = vsyncpa [#allocation6], 1 }
 0x1fd   :  { %359 = vsyncpa [#allocation9], 1 }
 0x1fe   :  { %360 = vsyncpa [#allocation4], 1 }
 0x1ff   :  { %361 = vsyncpa [#allocation13], 1 }

</bundles_post_ra>
